<compile_context>
chip_gen: v5e
topology: v5e:2x2
jax: 0.10.0
libtpu: 0.0.40
codegen_flags: <defaults>
</compile_context>

<pallas_src>
import functools

import jax
import jax.numpy as jnp
from jax.experimental import pallas as pl
from jax.experimental.pallas import tpu as pltpu


def _causal_conv1d_kernel(x_ref, w_ref, b_ref, o_ref, halo_ref, im2col_ref, *,
                          K, padding_mode):
    """One (batch b, L-tile j) grid step.

    x_ref     : (C_in, TL)         input tile (channels on sublanes, L on lanes)
    w_ref     : (C_out, K*C_in)    fused weights, w[o, t*C_in + i] = weight[o, i, t]
    b_ref     : (C_out, 1)         bias
    o_ref     : (C_out, TL)        output tile (lane-dense)
    halo_ref  : (C_in, max(K-1,1)) carries the last K-1 input columns of the previous
                                   L tile (the causal left context)
    im2col_ref: (K*C_in, TL)       scratch holding the im2col tile
    """
    j = pl.program_id(1)
    TL = o_ref.shape[1]
    x_cur = x_ref[...]

    if K == 1:
        lhs = x_cur
    else:
        H = K - 1

        # First L tile of every batch element: synthesize the causal left padding.
        @pl.when(j == 0)
        def _init_halo():
            if padding_mode == "zeros":
                halo_ref[...] = jnp.zeros_like(halo_ref)
            elif padding_mode == "reflect":
                # ReflectionPad1d((K-1, 0)): pad column h (h = 0..K-2) is x[:, K-1-h].
                cols = [x_cur[:, K - 1 - h:K - h] for h in range(H)]
                halo_ref[...] = cols[0] if H == 1 else jnp.concatenate(cols, axis=1)
            else:  # replicate (default)
                halo_ref[...] = jnp.broadcast_to(x_cur[:, 0:1], halo_ref.shape)

        # x_ext[:, c] == x_pad[:, j*TL + c] where x_pad is the causally padded input.
        x_ext = jnp.concatenate([halo_ref[...], x_cur], axis=1)   # (C_in, TL + K - 1)

        # im2col: row t*C_in + i at output column l holds x_pad[i, j*TL + l + t].
        C_in = x_cur.shape[0]
        for t in range(K):
            im2col_ref[t * C_in:(t + 1) * C_in, :] = x_ext[:, t:t + TL]
        lhs = im2col_ref[...]

        # Carry the last K-1 input columns for the next L tile of this batch element.
        halo_ref[...] = x_cur[:, TL - H:]

    # Single fused MXU matmul with f32 accumulation, then bias.
    acc = jnp.dot(w_ref[...], lhs, preferred_element_type=jnp.float32)
    acc = acc + b_ref[...].astype(jnp.float32)
    o_ref[...] = acc.astype(o_ref.dtype)


def causal_cnn1d(inp, weight, bias, *, padding_mode="replicate", stride=1, tile_l=1024):
    """inp: (B, C_in, L); weight: (C_out, C_in, K); bias: (C_out,) -> (B, C_out, L)."""
    # TODO(synk): strided causal conv (stride > 1) not implemented; module default is 1.
    assert stride == 1
    B, C_in, L = inp.shape
    C_out, C_in_w, K = weight.shape
    assert C_in == C_in_w and K >= 1

    # Sequence tiling: single full-length tile if it fits, else lane-aligned TL tiles.
    if L <= tile_l:
        TL, nL = L, 1
    else:
        TL = max(128, (tile_l // 128) * 128)   # keep output stores lane-dense (unmasked)
        nL = pl.cdiv(L, TL)                    # partial edge tile handled by masked stores

    # Fused tap-major weights: w_fused[o, t*C_in + i] = weight[o, i, t].
    w_fused = jnp.transpose(weight, (0, 2, 1)).reshape(C_out, K * C_in)
    b_2d = bias.reshape(C_out, 1)
    halo_w = max(K - 1, 1)

    kernel = functools.partial(_causal_conv1d_kernel, K=K, padding_mode=padding_mode)

    itemsize = inp.dtype.itemsize
    flops = 2 * B * L * K * C_in * C_out
    bytes_accessed = (B * L * (C_in + C_out) + C_out * (K * C_in + 1)) * itemsize

    # Per-step VMEM estimate: double-buffered in/out tiles + weights + scratch + f32 acc.
    tile_bytes = (2 * (C_in * TL + C_out * TL + C_out * K * C_in + C_out) * itemsize
                  + (K * C_in + C_in) * TL * itemsize + C_out * TL * 4)
    compiler_kwargs = dict(
        # Batch axis shards across TensorCores (megacore); the L axis must stay
        # "arbitrary" because the halo scratch is carried between consecutive L tiles.
        # TODO(synk): a "parallel" L axis (useful on v7x with B=1) would require
        # re-reading a small halo block from HBM instead of carrying it.
        dimension_semantics=("parallel", "arbitrary"),
    )
    if tile_bytes > 8 * 1024 * 1024:
        compiler_kwargs["vmem_limit_bytes"] = min(2 * tile_bytes + (1 << 20),
                                                  56 * 1024 * 1024)

    return pl.pallas_call(
        kernel,
        out_shape=jax.ShapeDtypeStruct((B, C_out, L), inp.dtype),
        grid_spec=pltpu.PrefetchScalarGridSpec(
            num_scalar_prefetch=0,
            grid=(B, nL),
            in_specs=[
                pl.BlockSpec((pl.Squeezed(), C_in, TL), lambda b, j: (b, 0, j)),
                pl.BlockSpec((C_out, K * C_in), lambda b, j: (0, 0)),
                pl.BlockSpec((C_out, 1), lambda b, j: (0, 0)),
            ],
            out_specs=pl.BlockSpec((pl.Squeezed(), C_out, TL), lambda b, j: (b, 0, j)),
            scratch_shapes=[
                pltpu.VMEM((C_in, halo_w), inp.dtype),     # carried halo
                pltpu.VMEM((K * C_in, TL), inp.dtype),     # im2col tile
            ],
        ),
        compiler_params=pltpu.CompilerParams(**compiler_kwargs),
        cost_estimate=pl.CostEstimate(
            flops=flops, transcendentals=0, bytes_accessed=bytes_accessed),
    )(inp, w_fused, b_2d)


if __name__ == "__main__":
    # Shapes consistent with the module's forward: inp (batch, d_model, inp_len).
    B, C_in, C_out, L, K = 2, 4, 8, 16, 3

    key = jax.random.PRNGKey(0)
    k_x, k_w, k_b, k_x2 = jax.random.split(key, 4)
    x = jax.random.normal(k_x, (B, C_in, L), dtype=jnp.float32)
    # Deterministic "PyTorch-like" uniform init for Conv1d parameters.
    bound = 1.0 / jnp.sqrt(jnp.float32(C_in * K))
    weight = jax.random.uniform(k_w, (C_out, C_in, K), jnp.float32, -bound, bound)
    bias = jax.random.uniform(k_b, (C_out,), jnp.float32, -bound, bound)

    def ref_conv(xv, wv, bv, mode):
        kk = wv.shape[-1]
        pad_mode = {"zeros": "constant", "reflect": "reflect"}.get(mode, "edge")
        xp = jnp.pad(xv, ((0, 0), (0, 0), (kk - 1, 0)), mode=pad_mode)
        y = jax.lax.conv_general_dilated(
            xp, wv, window_strides=(1,), padding="VALID",
            dimension_numbers=("NCH", "OIH", "NCH"),
            precision=jax.lax.Precision.HIGHEST)
        return y + bv[None, :, None]

    # Single-tile path, all three padding modes.
    for mode in ("replicate", "zeros", "reflect"):
        out = jax.block_until_ready(causal_cnn1d(x, weight, bias, padding_mode=mode))
        assert out.shape == (B, C_out, L)
        ref = ref_conv(x, weight, bias, mode)
        assert jnp.allclose(out, ref, atol=1e-4, rtol=1e-4), f"mismatch ({mode})"

    # Multi-tile path: halo carried across L tiles + masked partial edge tile.
    x2 = jax.random.normal(k_x2, (1, C_in, 300), dtype=jnp.float32)
    out2 = jax.block_until_ready(
        causal_cnn1d(x2, weight, bias, padding_mode="replicate", tile_l=128))
    ref2 = ref_conv(x2, weight, bias, "replicate")
    assert out2.shape == (1, C_out, 300)
    assert jnp.allclose(out2, ref2, atol=1e-4, rtol=1e-4), "mismatch (multi-tile)"

    print("KERNEL_OK")
</pallas_src>

<mosaic_0001>
module attributes {stable_mosaic.version = 11 : i64} {
  func.func @_causal_conv1d_kernel(%arg0: i32, %arg1: i32, %arg2: memref<1x4x16xf32, #tpu.memory_space<vmem>>, %arg3: memref<8x12xf32, #tpu.memory_space<vmem>>, %arg4: memref<8x1xf32, #tpu.memory_space<vmem>>, %arg5: memref<1x8x16xf32, #tpu.memory_space<vmem>>, %arg6: memref<4x2xf32, #tpu.memory_space<vmem>>, %arg7: memref<12x16xf32, #tpu.memory_space<vmem>>) attributes {dimension_semantics = [#tpu.dimension_semantics<parallel>, #tpu.dimension_semantics<arbitrary>], iteration_bounds = array<i64: 2, 1>, scalar_prefetch = 0 : i64, scratch_operands = 2 : i64, tpu.core_type = #tpu.core_type<tc>, window_params = [{transform_indices = @transform_0, window_bounds = array<i64: 1, 4, 16>}, {pipeline_mode = #tpu.pipeline_mode<synchronous>, transform_indices = @transform_1, window_bounds = array<i64: 8, 12>}, {pipeline_mode = #tpu.pipeline_mode<synchronous>, transform_indices = @transform_2, window_bounds = array<i64: 8, 1>}, {transform_indices = @transform_3, window_bounds = array<i64: 1, 8, 16>}]} {
    %c0 = arith.constant 0 : index
    %c0_0 = arith.constant 0 : index
    %c0_1 = arith.constant 0 : index
    %0 = vector.load %arg2[%c0, %c0_0, %c0_1] : memref<1x4x16xf32, #tpu.memory_space<vmem>>, vector<1x4x16xf32>
    %1 = vector.shape_cast %0 : vector<1x4x16xf32> to vector<4x16xf32>
    %c0_i32 = arith.constant 0 : i32
    %2 = arith.cmpi eq, %arg1, %c0_i32 : i32
    %3 = arith.extui %2 : i1 to i32
    %c0_i32_2 = arith.constant 0 : i32
    %4 = arith.cmpi ne, %3, %c0_i32_2 : i32
    scf.if %4 {
      %24 = vector.extract_strided_slice %1 {offsets = [0, 0], sizes = [4, 1], strides = [1, 1]} : vector<4x16xf32> to vector<4x1xf32>
      %25 = vector.shape_cast %24 : vector<4x1xf32> to vector<4x1xf32>
      %26 = vector.broadcast %25 : vector<4x1xf32> to vector<4x2xf32>
      %c0_20 = arith.constant 0 : index
      %c0_21 = arith.constant 0 : index
      %27 = vector.load %arg6[%c0_20, %c0_21] : memref<4x2xf32, #tpu.memory_space<vmem>>, vector<4x2xf32>
      tpu.vector_store %arg6[%c0_20, %c0_21], %26 {strides = array<i32>} : memref<4x2xf32, #tpu.memory_space<vmem>>, vector<4x2xf32>,
    } else {
    }
    %c0_3 = arith.constant 0 : index
    %c0_4 = arith.constant 0 : index
    %5 = vector.load %arg6[%c0_3, %c0_4] : memref<4x2xf32, #tpu.memory_space<vmem>>, vector<4x2xf32>
    %6 = tpu.concatenate %5, %1 in 1 : vector<4x2xf32>, vector<4x16xf32> -> vector<4x18xf32>
    %7 = vector.extract_strided_slice %6 {offsets = [0, 0], sizes = [4, 16], strides = [1, 1]} : vector<4x18xf32> to vector<4x16xf32>
    %c0_5 = arith.constant 0 : index
    %c0_6 = arith.constant 0 : index
    %8 = vector.load %arg7[%c0_5, %c0_6] : memref<12x16xf32, #tpu.memory_space<vmem>>, vector<4x16xf32>
    tpu.vector_store %arg7[%c0_5, %c0_6], %7 {strides = array<i32>} : memref<12x16xf32, #tpu.memory_space<vmem>>, vector<4x16xf32>,
    %9 = vector.extract_strided_slice %6 {offsets = [0, 1], sizes = [4, 16], strides = [1, 1]} : vector<4x18xf32> to vector<4x16xf32>
    %c4 = arith.constant 4 : index
    %c0_7 = arith.constant 0 : index
    %10 = vector.load %arg7[%c4, %c0_7] : memref<12x16xf32, #tpu.memory_space<vmem>>, vector<4x16xf32>
    tpu.vector_store %arg7[%c4, %c0_7], %9 {strides = array<i32>} : memref<12x16xf32, #tpu.memory_space<vmem>>, vector<4x16xf32>,
    %11 = vector.extract_strided_slice %6 {offsets = [0, 2], sizes = [4, 16], strides = [1, 1]} : vector<4x18xf32> to vector<4x16xf32>
    %c8 = arith.constant 8 : index
    %c0_8 = arith.constant 0 : index
    %12 = vector.load %arg7[%c8, %c0_8] : memref<12x16xf32, #tpu.memory_space<vmem>>, vector<4x16xf32>
    tpu.vector_store %arg7[%c8, %c0_8], %11 {strides = array<i32>} : memref<12x16xf32, #tpu.memory_space<vmem>>, vector<4x16xf32>,
    %c0_9 = arith.constant 0 : index
    %c0_10 = arith.constant 0 : index
    %13 = vector.load %arg7[%c0_9, %c0_10] : memref<12x16xf32, #tpu.memory_space<vmem>>, vector<12x16xf32>
    %14 = vector.extract_strided_slice %1 {offsets = [0, 14], sizes = [4, 2], strides = [1, 1]} : vector<4x16xf32> to vector<4x2xf32>
    %c0_11 = arith.constant 0 : index
    %c0_12 = arith.constant 0 : index
    %15 = vector.load %arg6[%c0_11, %c0_12] : memref<4x2xf32, #tpu.memory_space<vmem>>, vector<4x2xf32>
    tpu.vector_store %arg6[%c0_11, %c0_12], %14 {strides = array<i32>} : memref<4x2xf32, #tpu.memory_space<vmem>>, vector<4x2xf32>,
    %c0_13 = arith.constant 0 : index
    %c0_14 = arith.constant 0 : index
    %16 = vector.load %arg3[%c0_13, %c0_14] : memref<8x12xf32, #tpu.memory_space<vmem>>, vector<8x12xf32>
    %cst = arith.constant dense<0.000000e+00> : vector<8x16xf32>
    %17 = tpu.matmul %16, %13, %cst {dimension_numbers = #tpu.dot_dimension_numbers<[1], [0], [0], [1], [0, 0, 1, 1], [], []>} : vector<8x12xf32>, vector<12x16xf32>, vector<8x16xf32> -> vector<8x16xf32>
    %c0_15 = arith.constant 0 : index
    %c0_16 = arith.constant 0 : index
    %18 = vector.load %arg4[%c0_15, %c0_16] : memref<8x1xf32, #tpu.memory_space<vmem>>, vector<8x1xf32>
    %19 = vector.broadcast %18 : vector<8x1xf32> to vector<8x16xf32>
    %20 = arith.addf %17, %19 : vector<8x16xf32>
    %c0_17 = arith.constant 0 : index
    %c0_18 = arith.constant 0 : index
    %c0_19 = arith.constant 0 : index
    %21 = vector.load %arg5[%c0_17, %c0_18, %c0_19] : memref<1x8x16xf32, #tpu.memory_space<vmem>>, vector<1x8x16xf32>
    %22 = vector.shape_cast %21 : vector<1x8x16xf32> to vector<8x16xf32>
    %23 = vector.shape_cast %20 : vector<8x16xf32> to vector<1x8x16xf32>
    tpu.vector_store %arg5[%c0_17, %c0_18, %c0_19], %23 {strides = array<i32>} : memref<1x8x16xf32, #tpu.memory_space<vmem>>, vector<1x8x16xf32>,
    return
  }
  func.func @transform_0(%arg0: i32, %arg1: i32) -> (i32, i32, i32) {
    %c0_i32 = arith.constant 0 : i32
    %c0_i32_0 = arith.constant 0 : i32
    return %arg0, %c0_i32, %arg1 : i32, i32, i32
  }
  func.func @transform_1(%arg0: i32, %arg1: i32) -> (i32, i32) {
    %c0_i32 = arith.constant 0 : i32
    %c0_i32_0 = arith.constant 0 : i32
    %c0_i32_1 = arith.constant 0 : i32
    return %c0_i32, %c0_i32_0 : i32, i32
  }
  func.func @transform_2(%arg0: i32, %arg1: i32) -> (i32, i32) {
    %c0_i32 = arith.constant 0 : i32
    %c0_i32_0 = arith.constant 0 : i32
    %c0_i32_1 = arith.constant 0 : i32
    return %c0_i32, %c0_i32_0 : i32, i32
  }
  func.func @transform_3(%arg0: i32, %arg1: i32) -> (i32, i32, i32) {
    %c0_i32 = arith.constant 0 : i32
    %c0_i32_0 = arith.constant 0 : i32
    return %arg0, %c0_i32, %arg1 : i32, i32, i32
  }
}

</mosaic_0001>

<bundles_post_ra>
// kernel: tpu_custom_call.1
= control target key start
LH: loop header
LB: loop body
LE: loop exit
PB: predicated region body
PF: predicated region fallthrough
CT: control target
= control target key end

     0   :  { %8 = vsyncpa [#allocation5], 0  ;;  %s716_s0 = inlined_call_operand.vmem [shape: f32[2,4,16], index: 0, kind: input, shape index: {}]   ;;  %s717_s1 = inlined_call_operand.hbm [shape: f32[8,12], index: 1, kind: input, shape index: {}]   ;;  %s718_s2 = inlined_call_operand.vmem [shape: f32[8,1], index: 2, kind: input, shape index: {}]   ;;  %s719_s3 = inlined_call_operand.hbm [shape: f32[2,8,16], index: 3, kind: output, shape index: {}]  }
   0x1   :  { %9 = vsyncpa [#allocation6], 0 }
   0x2   :  { %11 = vsyncpa [#allocation6 + $0x1], 0  ;;  %s608_s12 = smov 0   ;;  %s610_s13 = smov 0  }
   0x3   :  { %s612_s14 = smov 0   ;;  %s614_s15 = smov 0  }
   0x4   :  { %s616_s16 = smov 0   ;;  %s618_s17 = smov 0  }
   0x5 LB: > { %s380_s18 = sadd.s32 4294967295, %s580_s17   ;;  %s381_s19 = sadd.s32 4294967294, %s580_s17   ;;  %s580_s17 = sphi %s618_s17, %s17_s17   ;;  %s576_s16 = sphi %s616_s16, %s726_s16   ;;  %s572_s15 = sphi %s614_s15, %s725_s15   ;;  %s568_s14 = sphi %s612_s14, %s724_s14   ;;  %s564_s13 = sphi %s610_s13, %s723_s13   ;;  %s560_s12 = sphi %s608_s12, %s722_s12  }
   0x6   : > { %s29_s20 = sadd.s32 1, %s576_s16  ;;  %s108_s21 = sadd.s32 1, %s568_s14 }
   0x7   : > { %p31_p0 = scmp.ge.s32.totalorder %s29_s20, 2  ;;  %p118_p1 = scmp.ne.s32.totalorder %s568_s14, %s564_s13 }
   0x8   : > { %p119_p2 = scmp.eq.s32.totalorder %s380_s18, 1  ;;  %p124_p3 = scmp.ne.s32.totalorder %s564_s13, %s560_s12 }
   0x9   : > { %s728_s20 = smov (%p31_p0, %s29_s20), 0  ;;  %p125_p5 = scmp.eq.s32.totalorder %s381_s19, 1 }
   0xa   : > { %p648_p4 = por %p119_p2, %p118_p1  ;;  %s103_s23 = ssub.s32 %s576_s16, %s728_s20 }
   0xb   : > { %p382_p6 = scmp.ge.s32.totalorder %s580_s17, 1  ;;  %p106_p7 = scmp.eq.s32.totalorder %s103_s23, 0 }
   0xc   : > { %p655_p8 = por %p125_p5, %p124_p3  ;;  %p132_p9 = scmp.lt.s32.totalorder %s580_s17, 3 }
   0xd   : > { %s661_s25 = scalar_select %p106_p7, %s568_s14, %s108_s21  }
   0xe   : > { %p133_p10 = pnand %p382_p6, %p132_p9  ;;  %p409_p11 = scmp.eq.s32.totalorder %s380_s18, 0 }
   0xf   : > { %s144_s28 = sshll.u32 %s717_s1, 4  ;;  %s582_s29 = smov [#allocation4]   ;;  %s145_s28 = int_to_ptr.hbm [resolvable:$true] %s144_s28 }
  0x10   : > { %p401_p12 = pneg %p133_p10  ;;  %s146_s30 = sshll.u32 %s582_s29, 4  ;;  %s147_s30 = int_to_ptr.vmem [resolvable:$true] %s146_s30 }
  0x11   : > { %172 = sbr.rel (%p133_p10) target bundleno = 417 (0x1a1), region = 32 }
  0x12   : > { %p402_p13 = pnand %p409_p11, %p401_p12 }
  0x14   : > { %404 = dma.hbm_to_vmem [thread:$0]  (!%p402_p13), %s145_s28, 128, %s147_s30, [#allocation5]  }
  0x16   : > { %551 = dma.done.wait (%p409_p11), [#allocation5], 128  }
  0x17   : > { %553 = vsyncadd (%p409_p11), [#allocation5], 4294967168  ;;  %p199_p0 = scmp.lt.s32.totalorder %s572_s15, 1  ;;  %v583_v0 = vmov 0   ;;  %s584_s9 = smov 2   ;;  %vm216_vm0 = vcmask 11264  }
  0x18   : > { %466 = vset.pattern.permute.xlu0 %v583_v0  ;;  %467 = vset.pattern.permute.xlu2 %v583_v0  ;;  %vm223_vm1 = vcmask 15360   ;;  %vm225_vm2 = vcmask 125952   ;;  %s585_s10 = smov 126   ;;  %s586_s11 = smov 127   ;;  %v244_v6 = vld [vmem:[%s718_s2] sm:$0xff]  ;;  %vm254_vm3 = vcmask 1043456  }
  0x19   : > { %s200_s4 = scalar_select %p199_p0, %s572_s15, 1  ;;  %247 = vperm.xlu2 %467, %v244_v6   ;;  %v243_v10 = vld [vmem:[#allocation4] sm:$0xff]  ;;  %vm250_vm4 = vcmask 97280   ;;  %vm278_vm5 = vcmask 130048  }
  0x1a   : > { %s587_s21 = smov 114   ;;  %s196_s23 = sand.u32 1, %s564_s13  }
  0x1b   : > { %s388_s5 = sshll.u32 %s200_s4, 2  ;;  %s387_s26 = sshll.u32 %s196_s23, 3 }
  0x1c   : > { %s205_s8 = scalar_lea.vmem %s716_s0, %s388_s5  ;;  %s392_s27 = sshll.u32 %s572_s15, 3 }
  0x1d   : > { %v206_v1 = vld [vmem:[%s205_s8] sm:$0xf]  ;;  %s292_s30 = scalar_lea.hbm %s719_s3, %s392_s27  ;;  %s198_s4 = scalar_lea.vmem [#allocation7], %s387_s26 }
  0x1e   : > { %213 = vperm.xlu0 %466, %v206_v1   ;;  %s294_s5 = sshll.u32 %s198_s4, 4  ;;  %s296_s6 = sshll.u32 %s292_s30, 4  ;;  %s295_s5 = int_to_ptr.vmem [resolvable:$true] %s294_s5  ;;  %s297_s6 = int_to_ptr.hbm [resolvable:$true] %s296_s6 }
  0x1f   : > { %s281_s7 = scalar_lea.sflag [#allocation6], %s196_s23  ;;  %s512_s8 = sshra.s32 %s297_s6, 4  ;;  %s513_s8 = int_to_ptr.hbm [resolvable:$true] %s512_s8 }
  0x20   : > { %p519_p5 = scmp.lt.s32.totalorder %s513_s8, %s719_s3 }
  0x21   : > { %238 = vrot.lane.b32.xlu2 %v206_v1, %s587_s21 }
  0x26   : > { %220 = vrot.lane.b32.xlu0 %v206_v1, %s584_s9  ;;  %s514_s9 = scalar_lea.hbm %s513_s8, 8 }
  0x27   : > { %p515_p1 = scmp.ne.s32.totalorder %s513_s8, %s514_s9 }
  0x29   : > { %p516_p2 = pnand %p515_p1, %p648_p4 }
  0x2b   : > { %p517_p3 = pneg %p516_p2 }
  0x73   : > { %v248_v12 = vpop.permute.xlu2 %247 }
  0x7b   : > { %v239_v13 = vpop.permute.xlu2 %238 }
  0x90   : > { %v214_v2 = vpop.permute.xlu0 %213 }
  0x91   : > { %217 = vst.msk [vmem:[#allocation2] sm:$0xf] %vm216_vm0, %v214_v2 }
  0x98   : > { %v221_v3 = vpop.permute.xlu0 %220  ;;  %v218_v4 = vld [vmem:[#allocation2] sm:$0xf] }
  0x99   : > { %v224_v5 = vsel %vm223_vm1, %v218_v4, %v221_v3  ;;  %242 = vst.msk [vmem:[#allocation2] sm:$0xf] %vm216_vm0, %v239_v13 }
  0x9a   : > { %232 = vrot.lane.b32.xlu1 %v224_v5, %s585_s10  ;;  %226 = vst.msk [vmem:[#allocation3] sm:$0xf] %vm225_vm2, %v224_v5 }
  0xa2   : > { %228 = vrot.lane.b32.xlu1 %v224_v5, %s586_s11  ;;  %s518_s11 = scalar_lea.hbm %s719_s3, 16 }
  0xa3   : > { %p520_p6 = scmp.lt.s32.totalorder %s518_s11, %s514_s9 }
  0xa5   : > { %p521_p7 = por %p520_p6, %p519_p5 }
  0xa7   : > { %p522_p9 = pnand %p521_p7, %p517_p3 }
 0x10c   : > { %v233_v7 = vpop.permute.xlu1 %232 }
 0x10d   : > { %235 = vst.msk [vmem:[#allocation3 + $0x8] sm:$0xf] %vm225_vm2, %v233_v7 }
 0x114   : > { %v229_v8 = vpop.permute.xlu1 %228  ;;  %v237_v9 = vld [vmem:[#allocation3 + $0x8] sm:$0xf] }
 0x115   : > { %231 = vst.msk [vmem:[#allocation3 + $0x4] sm:$0xf] %vm225_vm2, %v229_v8  ;;  %389 = vmatpush.msk.msra.mxu0 %vm254_vm3, %v237_v9 }
 0x11c   : > { %v236_v11 = vld [vmem:[#allocation3] sm:$0xff] }
 0x11d   : > { %273 = vmatpush.msra.mxu0 %v236_v11 }
 0x11e   : > { %390 = vmatmul.msk.f32.vlgmr.msra.gmra.mxu0 %vm250_vm4, %v243_v10 }
 0x19b   : > { %v275_v14 = vpop.f32.mrf.mxu0 }
 0x19c   : > { %v276_v15 = vadd.f32 %v275_v14, %v248_v12 }
 0x19e   : > { %279 = vst.msk [vmem:[%s198_s4] sm:$0xff] %vm278_vm5, %v276_v15 }
 0x19f   : > { %525 = shalt.err (!%p522_p9)
}
 0x1a0   : > { %399 = dma.vmem_to_hbm [thread:$0]  (%p648_p4), %s295_s5, 128, %s297_s6, %s281_s7  }
 0x1a1 PF: > { %p411_p10 = scmp.ge.s32.totalorder %s580_s17, 2  ;;  %s308_s21 = sand.u32 1, %s560_s12  }
 0x1a2   : > { %s309_s23 = scalar_lea.sflag [#allocation6], %s308_s21 }
 0x1a3   : > { %p406_p11 = pnand %p411_p10, %p655_p8 }
 0x1a5   : > { %p407_p12 = pneg %p406_p11 }
 0x1a7   : > { %555 = dma.done.wait (%p407_p12), %s309_s23, 128  }
 0x1a8   : > { %557 = vsyncadd (%p407_p12), %s309_s23, 4294967168  ;;  %s17_s17 = sadd.s32 1, %s580_s17   ;;  %s722_s12 = smov %s564_s13 }
 0x1a9   : > { %p14_p13 = scmp.ge.s32.totalorder %s17_s17, 4   ;;  %s723_s13 = smov %s568_s14 }
 0x1aa   : > { %s724_s14 = smov %s661_s25  ;;  %s725_s15 = smov %s576_s16 }
 0x1ab   : > { %s726_s16 = smov %s728_s20  ;;  %16 = sbr.rel (!%p14_p13) target bundleno = 5 (0x5), region = 76 }
 0x1b0   :  { %315 = vsyncpa [#allocation5], 1 }
 0x1b1   :  { %317 = vsyncpa [#allocation5 + $0x1], 1 }
 0x1b2   :  { %318 = vsyncpa [#allocation6], 1 }
 0x1b3   :  { %320 = vsyncpa [#allocation6 + $0x1], 1 }

</bundles_post_ra>
